<compile_context>
chip_gen: v5e
topology: v5e:2x2
jax: 0.10.0
libtpu: 0.0.40
codegen_flags: <defaults>
</compile_context>

<pallas_src>
import functools

import jax
import jax.numpy as jnp
from jax import lax
from jax.experimental import pallas as pl
from jax.experimental.pallas import tpu as pltpu


def _round_up(n: int, m: int) -> int:
    return (n + m - 1) // m * m


def _sobel_kernel(x_ref, top_ref, bot_ref, out_ref, *, H: int):
    """x_ref:   (TH, W) image rows [i*TH, i*TH+TH)   (rows >= H are garbage -> masked)
    top_ref: (8, W)  image rows [i*TH-8, i*TH)       (row 7 = row just above the tile)
    bot_ref: (8, W)  image rows [(i+1)*TH, +8)       (row 0 = row just below the tile)
    out_ref: (2, TH, W) channel 0 = -G_y, channel 1 = G_x."""
    i = pl.program_id(0)
    TH, W = x_ref.shape

    x = x_ref[...]
    if H % TH != 0:
        # Ragged last tile: zero the rows past the image bottom so they do not
        # leak into the stencil of the last valid row.
        ridx = lax.broadcasted_iota(jnp.int32, (TH, W), 0) + i * TH
        x = jnp.where(ridx < H, x, 0.0)

    # Halo rows: conv zero row-padding folded into cheap scalar masks.
    top = top_ref[...] * jnp.where(i > 0, 1.0, 0.0)
    bot = bot_ref[...] * jnp.where((i + 1) * TH < H, 1.0, 0.0)

    # (TH+16, W) window; every concat boundary is 8-row (sublane) aligned.
    # Window row 8+s is image row i*TH+s; rows 7 / TH+8 are the halo rows.
    win = jnp.concatenate([top, x, bot], axis=0)

    # Column taps (conv zero column-padding generated in-kernel, no padded copy).
    if W % 128 == 0:
        cidx = lax.broadcasted_iota(jnp.int32, win.shape, 1)
        # XLU rolls + VPU edge masks (shift W-1 == -1 mod W, kept non-negative).
        left = jnp.where(cidx == 0, 0.0, pltpu.roll(win, 1, axis=1))          # col j-1
        right = jnp.where(cidx == W - 1, 0.0, pltpu.roll(win, W - 1, axis=1))  # col j+1
    else:
        zcol = jnp.zeros((win.shape[0], 1), win.dtype)
        left = jnp.concatenate([zcol, win[:, :W - 1]], axis=1)                # col j-1
        right = jnp.concatenate([win[:, 1:], zcol], axis=1)                   # col j+1

    # Separable horizontal passes.
    hd = left - right                  # [1, 0, -1]
    hs = left + win + win + right      # [1, 2, 1]

    # Vertical passes; the 3 row taps of output row s are window rows s+7 .. s+9.
    out_ref[1] = hd[7:TH + 7] + hd[8:TH + 8] + hd[8:TH + 8] + hd[9:TH + 9]   # G_x
    out_ref[0] = hs[9:TH + 9] - hs[7:TH + 7]                                 # -G_y


@jax.jit
def sobel_forward(x):
    """x: (N, 1, H, W).  Returns (1, 2, H, W) float32 (uses batch element 0)."""
    N, C, H, W = x.shape
    assert C == 1, "Sobel module uses Conv2d(1, 1, ...)"
    if x.dtype != jnp.float32:
        x = x.astype(jnp.float32)

    # Row tile: multiple of 8, aiming for ~8 grid steps (pipeline depth / megacore)
    # while pipeline blocks + ~14 kernel-internal tile-sized f32 temporaries stay
    # around <= 20 MiB of scoped VMEM.
    est_bufs = 20                       # ~6 double-buffered pipeline blocks + ~14 temporaries
    vmem_budget = 20 * 1024 * 1024
    th_vmem = max(8, (vmem_budget // (est_bufs * 4 * W)) // 8 * 8)
    th_steps = max(8, _round_up(pl.cdiv(H, 8), 8))
    TH = max(8, min(512, th_vmem, th_steps))
    nt = pl.cdiv(H, TH)
    thb = TH // 8                       # tile height in 8-row halo blocks
    nb8 = max(pl.cdiv(H, 8), 1)         # number of 8-row blocks in the image

    kernel = functools.partial(_sobel_kernel, H=H)

    return pl.pallas_call(
        kernel,
        out_shape=jax.ShapeDtypeStruct((1, 2, H, W), jnp.float32),
        grid=(nt,),
        in_specs=[
            # Main tile rows; batch 0 / channel 0 selected (and squeezed) by the spec.
            pl.BlockSpec((None, None, TH, W), lambda i: (0, 0, i, 0)),
            # 8-row block just above this tile (clamped for the first tile; masked in-kernel).
            pl.BlockSpec((None, None, 8, W),
                         lambda i: (0, 0, jnp.maximum(i * thb - 1, 0), 0)),
            # 8-row block just below this tile (clamped for the last tile; masked in-kernel).
            pl.BlockSpec((None, None, 8, W),
                         lambda i: (0, 0, jnp.minimum((i + 1) * thb, nb8 - 1), 0)),
        ],
        out_specs=pl.BlockSpec((None, 2, TH, W), lambda i: (0, 0, i, 0)),
        compiler_params=pltpu.CompilerParams(
            dimension_semantics=("parallel",),
            vmem_limit_bytes=48 * 1024 * 1024),
        cost_estimate=pl.CostEstimate(
            flops=10 * H * W, transcendentals=0, bytes_accessed=12 * H * W),
    )(x, x, x)


def _reference(x):
    """Pure-jnp reference of the PyTorch forward (independent formulation)."""
    a = jnp.array([[1, 0, -1], [2, 0, -2], [1, 0, -1]], jnp.float32)
    b = jnp.array([[1, 2, 1], [0, 0, 0], [-1, -2, -1]], jnp.float32)
    img = x[0, 0].astype(jnp.float32)
    H, W = img.shape
    xp = jnp.pad(img, ((1, 1), (1, 1)))
    gx = jnp.zeros((H, W), jnp.float32)
    gy = jnp.zeros((H, W), jnp.float32)
    for di in range(3):
        for dj in range(3):
            win = xp[di:di + H, dj:dj + W]
            gx = gx + a[di, dj] * win
            gy = gy + b[di, dj] * win
    return jnp.stack([-gy, gx], axis=0)[None]


if __name__ == "__main__":
    # Small shape consistent with the module: N=2, C=1 (required by Conv2d(1,1,..)).
    x = jax.random.normal(jax.random.PRNGKey(0), (2, 1, 16, 16), dtype=jnp.float32)
    out = jax.block_until_ready(sobel_forward(x))
    assert out.shape == (1, 2, 16, 16), out.shape
    assert jnp.allclose(out, _reference(x), atol=1e-5, rtol=1e-5)

    # Lane-aligned width: exercises the pltpu.roll column-tap path and a
    # multi-tile row pipeline with both halos.
    x2 = jax.random.normal(jax.random.PRNGKey(0), (2, 1, 64, 128), dtype=jnp.float32)
    out2 = jax.block_until_ready(sobel_forward(x2))
    assert out2.shape == (1, 2, 64, 128), out2.shape
    assert jnp.allclose(out2, _reference(x2), atol=1e-5, rtol=1e-5)

    print("KERNEL_OK")
</pallas_src>

<mosaic_0001>
module attributes {stable_mosaic.version = 11 : i64} {
  func.func @_sobel_kernel(%arg0: i32, %arg1: memref<1x1x8x16xf32, #tpu.memory_space<vmem>>, %arg2: memref<1x1x8x16xf32, #tpu.memory_space<vmem>>, %arg3: memref<1x1x8x16xf32, #tpu.memory_space<vmem>>, %arg4: memref<1x2x8x16xf32, #tpu.memory_space<vmem>>) attributes {dimension_semantics = [#tpu.dimension_semantics<parallel>], iteration_bounds = array<i64: 2>, scalar_prefetch = 0 : i64, scratch_operands = 0 : i64, tpu.core_type = #tpu.core_type<tc>, window_params = [{transform_indices = @transform_0, window_bounds = array<i64: 1, 1, 8, 16>}, {transform_indices = @transform_1, window_bounds = array<i64: 1, 1, 8, 16>}, {transform_indices = @transform_2, window_bounds = array<i64: 1, 1, 8, 16>}, {transform_indices = @transform_3, window_bounds = array<i64: 1, 2, 8, 16>}]} {
    %c0 = arith.constant 0 : index
    %c0_0 = arith.constant 0 : index
    %c0_1 = arith.constant 0 : index
    %c0_2 = arith.constant 0 : index
    %0 = vector.load %arg1[%c0, %c0_0, %c0_1, %c0_2] : memref<1x1x8x16xf32, #tpu.memory_space<vmem>>, vector<1x1x8x16xf32>
    %1 = vector.shape_cast %0 : vector<1x1x8x16xf32> to vector<8x16xf32>
    %c0_3 = arith.constant 0 : index
    %c0_4 = arith.constant 0 : index
    %c0_5 = arith.constant 0 : index
    %c0_6 = arith.constant 0 : index
    %2 = vector.load %arg2[%c0_3, %c0_4, %c0_5, %c0_6] : memref<1x1x8x16xf32, #tpu.memory_space<vmem>>, vector<1x1x8x16xf32>
    %3 = vector.shape_cast %2 : vector<1x1x8x16xf32> to vector<8x16xf32>
    %c0_i32 = arith.constant 0 : i32
    %4 = arith.cmpi sgt, %arg0, %c0_i32 : i32
    %cst = arith.constant 1.000000e+00 : f32
    %cst_7 = arith.constant 0.000000e+00 : f32
    %5 = arith.select %4, %cst, %cst_7 : f32
    %6 = vector.broadcast %5 : f32 to vector<8x16xf32>
    %7 = arith.mulf %3, %6 : vector<8x16xf32>
    %c0_8 = arith.constant 0 : index
    %c0_9 = arith.constant 0 : index
    %c0_10 = arith.constant 0 : index
    %c0_11 = arith.constant 0 : index
    %8 = vector.load %arg3[%c0_8, %c0_9, %c0_10, %c0_11] : memref<1x1x8x16xf32, #tpu.memory_space<vmem>>, vector<1x1x8x16xf32>
    %9 = vector.shape_cast %8 : vector<1x1x8x16xf32> to vector<8x16xf32>
    %c1_i32 = arith.constant 1 : i32
    %10 = arith.addi %arg0, %c1_i32 : i32
    %c8_i32 = arith.constant 8 : i32
    %11 = arith.muli %10, %c8_i32 : i32
    %c16_i32 = arith.constant 16 : i32
    %12 = arith.cmpi slt, %11, %c16_i32 : i32
    %cst_12 = arith.constant 1.000000e+00 : f32
    %cst_13 = arith.constant 0.000000e+00 : f32
    %13 = arith.select %12, %cst_12, %cst_13 : f32
    %14 = vector.broadcast %13 : f32 to vector<8x16xf32>
    %15 = arith.mulf %9, %14 : vector<8x16xf32>
    %16 = tpu.concatenate %7, %1, %15 in 0 : vector<8x16xf32>, vector<8x16xf32>, vector<8x16xf32> -> vector<24x16xf32>
    %cst_14 = arith.constant 0.000000e+00 : f32
    %17 = vector.broadcast %cst_14 : f32 to vector<24x1xf32>
    %18 = vector.extract_strided_slice %16 {offsets = [0, 0], sizes = [24, 15], strides = [1, 1]} : vector<24x16xf32> to vector<24x15xf32>
    %19 = tpu.concatenate %17, %18 in 1 : vector<24x1xf32>, vector<24x15xf32> -> vector<24x16xf32>
    %20 = vector.extract_strided_slice %16 {offsets = [0, 1], sizes = [24, 15], strides = [1, 1]} : vector<24x16xf32> to vector<24x15xf32>
    %21 = tpu.concatenate %20, %17 in 1 : vector<24x15xf32>, vector<24x1xf32> -> vector<24x16xf32>
    %22 = arith.subf %19, %21 : vector<24x16xf32>
    %23 = arith.addf %19, %16 : vector<24x16xf32>
    %24 = arith.addf %23, %16 : vector<24x16xf32>
    %25 = arith.addf %24, %21 : vector<24x16xf32>
    %26 = vector.extract_strided_slice %22 {offsets = [7, 0], sizes = [8, 16], strides = [1, 1]} : vector<24x16xf32> to vector<8x16xf32>
    %27 = vector.extract_strided_slice %22 {offsets = [8, 0], sizes = [8, 16], strides = [1, 1]} : vector<24x16xf32> to vector<8x16xf32>
    %28 = arith.addf %26, %27 : vector<8x16xf32>
    %29 = vector.extract_strided_slice %22 {offsets = [8, 0], sizes = [8, 16], strides = [1, 1]} : vector<24x16xf32> to vector<8x16xf32>
    %30 = arith.addf %28, %29 : vector<8x16xf32>
    %31 = vector.extract_strided_slice %22 {offsets = [9, 0], sizes = [8, 16], strides = [1, 1]} : vector<24x16xf32> to vector<8x16xf32>
    %32 = arith.addf %30, %31 : vector<8x16xf32>
    %c0_15 = arith.constant 0 : index
    %c1 = arith.constant 1 : index
    %c0_16 = arith.constant 0 : index
    %c0_17 = arith.constant 0 : index
    %33 = vector.load %arg4[%c0_15, %c1, %c0_16, %c0_17] : memref<1x2x8x16xf32, #tpu.memory_space<vmem>>, vector<1x1x8x16xf32>
    %34 = vector.shape_cast %33 : vector<1x1x8x16xf32> to vector<8x16xf32>
    %35 = vector.shape_cast %32 : vector<8x16xf32> to vector<1x1x8x16xf32>
    tpu.vector_store %arg4[%c0_15, %c1, %c0_16, %c0_17], %35 {strides = array<i32>} : memref<1x2x8x16xf32, #tpu.memory_space<vmem>>, vector<1x1x8x16xf32>,
    %36 = vector.extract_strided_slice %25 {offsets = [9, 0], sizes = [8, 16], strides = [1, 1]} : vector<24x16xf32> to vector<8x16xf32>
    %37 = vector.extract_strided_slice %25 {offsets = [7, 0], sizes = [8, 16], strides = [1, 1]} : vector<24x16xf32> to vector<8x16xf32>
    %38 = arith.subf %36, %37 : vector<8x16xf32>
    %c0_18 = arith.constant 0 : index
    %c0_19 = arith.constant 0 : index
    %c0_20 = arith.constant 0 : index
    %c0_21 = arith.constant 0 : index
    %39 = vector.load %arg4[%c0_18, %c0_19, %c0_20, %c0_21] : memref<1x2x8x16xf32, #tpu.memory_space<vmem>>, vector<1x1x8x16xf32>
    %40 = vector.shape_cast %39 : vector<1x1x8x16xf32> to vector<8x16xf32>
    %41 = vector.shape_cast %38 : vector<8x16xf32> to vector<1x1x8x16xf32>
    tpu.vector_store %arg4[%c0_18, %c0_19, %c0_20, %c0_21], %41 {strides = array<i32>} : memref<1x2x8x16xf32, #tpu.memory_space<vmem>>, vector<1x1x8x16xf32>,
    return
  }
  func.func @transform_0(%arg0: i32) -> (i32, i32, i32, i32) {
    %c0_i32 = arith.constant 0 : i32
    %c0_i32_0 = arith.constant 0 : i32
    %c0_i32_1 = arith.constant 0 : i32
    %c0_i32_2 = arith.constant 0 : i32
    return %c0_i32, %c0_i32_0, %arg0, %c0_i32_1 : i32, i32, i32, i32
  }
  func.func @transform_1(%arg0: i32) -> (i32, i32, i32, i32) {
    %c1_i32 = arith.constant 1 : i32
    %0 = arith.muli %arg0, %c1_i32 : i32
    %c1_i32_0 = arith.constant 1 : i32
    %1 = arith.subi %0, %c1_i32_0 : i32
    %c0_i32 = arith.constant 0 : i32
    %2 = arith.maxsi %1, %c0_i32 : i32
    %c0_i32_1 = arith.constant 0 : i32
    %c0_i32_2 = arith.constant 0 : i32
    %c0_i32_3 = arith.constant 0 : i32
    %c0_i32_4 = arith.constant 0 : i32
    return %c0_i32_1, %c0_i32_2, %2, %c0_i32_3 : i32, i32, i32, i32
  }
  func.func @transform_2(%arg0: i32) -> (i32, i32, i32, i32) {
    %c1_i32 = arith.constant 1 : i32
    %0 = arith.addi %arg0, %c1_i32 : i32
    %c1_i32_0 = arith.constant 1 : i32
    %1 = arith.muli %0, %c1_i32_0 : i32
    %c1_i32_1 = arith.constant 1 : i32
    %2 = arith.minsi %1, %c1_i32_1 : i32
    %c0_i32 = arith.constant 0 : i32
    %c0_i32_2 = arith.constant 0 : i32
    %c0_i32_3 = arith.constant 0 : i32
    %c0_i32_4 = arith.constant 0 : i32
    return %c0_i32, %c0_i32_2, %2, %c0_i32_3 : i32, i32, i32, i32
  }
  func.func @transform_3(%arg0: i32) -> (i32, i32, i32, i32) {
    %c0_i32 = arith.constant 0 : i32
    %c0_i32_0 = arith.constant 0 : i32
    %c0_i32_1 = arith.constant 0 : i32
    %c0_i32_2 = arith.constant 0 : i32
    return %c0_i32, %c0_i32_0, %arg0, %c0_i32_1 : i32, i32, i32, i32
  }
}

</mosaic_0001>

<bundles_post_ra>
// kernel: sobel_forward.1
= control target key start
LH: loop header
LB: loop body
LE: loop exit
PB: predicated region body
PF: predicated region fallthrough
CT: control target
= control target key end

     0   :  { %s1183_s0 = inlined_call_operand.hbm [shape: f32[2,1,16,16], index: 0, kind: input, shape index: {}, may-alias: {0,1,2}]   ;;  %s1184_s1 = inlined_call_operand.hbm [shape: f32[2,1,16,16], index: 1, kind: input, shape index: {}, may-alias: {0,1,2}]   ;;  %s1185_s2 = inlined_call_operand.hbm [shape: f32[2,1,16,16], index: 2, kind: input, shape index: {}, may-alias: {0,1,2}]   ;;  %s1186_s3 = inlined_call_operand.hbm [shape: f32[1,2,16,16], index: 3, kind: output, shape index: {}]  }
   0x1   :  { %1194 = sst [smem:[#allocation18_spill]] %s1184_s1 }
   0x2   :  { %8 = vsyncpa [#allocation3], 0 }
   0x3   :  { %10 = vsyncpa [#allocation3 + $0x1], 0 }
   0x4   :  { %11 = vsyncpa [#allocation6], 0 }
   0x5   :  { %13 = vsyncpa [#allocation6 + $0x1], 0 }
   0x6   :  { %14 = vsyncpa [#allocation4], 0 }
   0x7   :  { %16 = vsyncpa [#allocation4 + $0x1], 0  ;;  %s881_s12 = smov 0   ;;  %s883_s13 = smov 0  }
   0x8   :  { %s885_s14 = smov 0   ;;  %s887_s15 = smov 0  }
   0x9   :  { %s889_s16 = smov 0   ;;  %s891_s17 = smov 0  }
   0xa   :  { %s893_s18 = smov 0   ;;  %s895_s19 = smov 0  }
   0xb   :  { %s897_s20 = smov 0   ;;  %s899_s21 = smov 0  }
   0xc LB: > { %1195 = sst [smem:[#allocation13_spill]] %s838_s17  ;;  %s930_s22 = sadd.s32 4294967295, %s854_s21   ;;  %s854_s21 = sphi %s899_s21, %s1232_s21   ;;  %s850_s20 = sphi %s897_s20, %s1224_s20   ;;  %s846_s19 = sphi %s895_s19, %s1231_s19   ;;  %s842_s18 = sphi %s893_s18, %s1230_s18   ;;  %s838_s17 = sphi %s891_s17, %s1222_s17   ;;  %s834_s16 = sphi %s889_s16, %s1229_s16   ;;  %s830_s15 = sphi %s887_s15, %s1228_s15   ;;  %s826_s14 = sphi %s885_s14, %s1227_s14   ;;  %s822_s13 = sphi %s883_s13, %s1226_s13   ;;  %s818_s12 = sphi %s881_s12, %s1225_s12  }
   0xd   : > { %1196 = sst [smem:[#allocation14_spill]] %s850_s20  ;;  %s933_s23 = sadd.s32 1, %s854_s21  }
   0xe   : > { %p1193_p0 = scmp.eq.s32.totalorder %s854_s21, 0  ;;  %p1192_p1 = scmp.eq.s32.totalorder %s930_s22, 0 }
   0xf   : > { %p1187_p2 = scmp.gt.s32.totalorder %s930_s22, 0  ;;  %s509_s24 = sadd.s32 4294967295, %s933_s23 }
  0x10   : > { %p56_p3 = scmp.gt.s32.totalorder %s509_s24, 0  ;;  %s61_s25 = sadd.s32 1, %s838_s17 }
  0x11   : > { %s54_s26 = scalar_select %p1187_p2, %s930_s22, 0 }
  0x12   : > { %s1234_s24 = smov (!%p56_p3, %s509_s24), 0  ;;  %p68_p4 = scmp.ne.s32.totalorder %s838_s17, %s834_s16 }
  0x13   : > { %p74_p5 = scmp.ne.s32.totalorder %s834_s16, %s830_s15  ;;  %s58_s27 = ssub.s32 %s54_s26, %s1234_s24 }
  0x14   : > { %p59_p7 = scmp.eq.s32.totalorder %s58_s27, 0  ;;  %p949_p8 = por %p68_p4, %p1193_p0 }
  0x15   : > { %p955_p9 = por %p74_p5, %p1192_p1  ;;  %p1188_p11 = scmp.lt.s32.totalorder %s854_s21, 2 }
  0x16   : > { %s961_s30 = scalar_select %p59_p7, %s838_s17, %s61_s25  }
  0x17   : > { %s175_s4 = sand.u32 1, %s854_s21   ;;  %s177_s5 = sand.u32 1, %s838_s17  }
  0x18   : > { %1199 = sst [smem:[#allocation15_spill]] %s961_s30  ;;  %s514_s6 = sshll.u32 %s177_s5, 3 }
  0x19   : > { %s516_s7 = sshll.u32 %s54_s26, 3  ;;  %s1200_s1 = sld [smem:[#allocation18_spill]] }
  0x1a   : > { %s179_s15 = scalar_lea.vmem [#allocation5], %s514_s6  ;;  %p973_p12 = pnand %p1188_p11, %p949_p8 }
  0x1b   : > { %s190_s24 = sshll.u32 %s179_s15, 4  ;;  %p519_p13 = scmp.ge.s32.totalorder %s854_s21, 1  ;;  %s191_s24 = int_to_ptr.vmem [resolvable:$true] %s190_s24 }
  0x1c   : > { %p217_p3 = scmp.lt.s32.totalorder %s854_s21, 3  ;;  %s979_s25 = scalar_lea.sflag [#allocation6], %s175_s4 }
  0x1d   : > { %p646_p5 = pneg %p973_p12 }
  0x1f   : > { %s186_s10 = scalar_lea.hbm %s1200_s1, %s516_s7  ;;  %s649_s7 = scalar_lea.hbm %s1200_s1, 32 }
  0x20   : > { %s188_s11 = sshll.u32 %s186_s10, 4  ;;  %s189_s11 = int_to_ptr.hbm [resolvable:$true] %s188_s11 }
  0x21   : > { %s642_s26 = sshra.s32 %s189_s11, 4  ;;  %s643_s26 = int_to_ptr.hbm [resolvable:$true] %s642_s26 }
  0x22   : > { %s644_s5 = scalar_lea.hbm %s643_s26, 8  ;;  %p650_p8 = scmp.lt.s32.totalorder %s643_s26, %s1200_s1 }
  0x23   : > { %p645_p4 = scmp.ne.s32.totalorder %s643_s26, %s644_s5  ;;  %p651_p2 = scmp.lt.s32.totalorder %s649_s7, %s644_s5 }
  0x25   : > { %p647_p7 = pnand %p646_p5, %p645_p4  ;;  %p652_p11 = por %p651_p2, %p650_p8 }
  0x27   : > { %p648_p10 = pneg %p647_p7 }
  0x29   : > { %p653_p6 = pnand %p652_p11, %p648_p10 }
  0x2b   : > { %656 = shalt.err (!%p653_p6)
}
  0x2c   : > { %547 = dma.hbm_to_vmem [thread:$0]  (!%p973_p12), %s189_s11, 128, %s191_s24, %s979_s25  }
  0x2d   : > { %p996_p2 = pnand %p519_p13, %p217_p3  ;;  %s507_s10 = sadd.s32 4294967294, %s854_s21  }
  0x2e   : > { %s26_s15 = ssub.s32 %s854_s21, %s933_s23  ;;  %s29_s27 = sadd.s32 1, %s850_s20 }
  0x2f   : > { %p27_p6 = scmp.eq.s32.totalorder %s26_s15, 0  ;;  %p36_p10 = scmp.ne.s32.totalorder %s850_s20, %s846_s19 }
  0x30   : > { %p42_p11 = scmp.ne.s32.totalorder %s846_s19, %s842_s18  ;;  %p136_p4 = scmp.eq.s32.totalorder %s507_s10, 1 }
  0x31   : > { %s1009_s26 = scalar_select %p27_p6, %s850_s20, %s29_s27  }
  0x32   : > { %p1013_p5 = por %p1193_p0, %p36_p10  ;;  %p1019_p12 = por %p1192_p1, %p42_p11 }
  0x33   : > { %1203 = sst [smem:[#allocation16_spill]] %s1009_s26  ;;  %p1206_p13 = scmp.eq.s32.totalorder %s930_s22, 1 }
  0x34   : > { %p1029_p7 = por %p136_p4, %p42_p11  ;;  %s156_s28 = sand.u32 1, %s850_s20  }
  0x35   : > { %p1025_p3 = por %p1206_p13, %p36_p10  ;;  %s513_s7 = sshll.u32 %s854_s21, 3 }
  0x36   : > { %s1208_s6 = scalar_select %p1029_p7, 1, 0 }
  0x37   : > { %s512_s8 = sshll.u32 %s156_s28, 3  ;;  %s164_s15 = scalar_lea.hbm %s1183_s0, %s513_s7 }
  0x38   : > { %1209 = sst [smem:[#allocation17_spill]] %s1208_s6  ;;  %s166_s27 = sshll.u32 %s164_s15, 4  ;;  %s167_s27 = int_to_ptr.hbm [resolvable:$true] %s166_s27 }
  0x39   : > { %s160_s1 = scalar_lea.vmem [#allocation2], %s512_s8  ;;  %p1210_p8 = scmp.lt.s32.totalorder %s854_s21, 2 }
  0x3a   : > { %s168_s26 = sshll.u32 %s160_s1, 4  ;;  %s157_s17 = scalar_lea.sflag [#allocation3], %s156_s28  ;;  %s169_s26 = int_to_ptr.vmem [resolvable:$true] %s168_s26 }
  0x3b   : > { %p1042_p6 = pnand %p1210_p8, %p1013_p5  ;;  %s672_s20 = sshra.s32 %s167_s27, 4  ;;  %s673_s20 = int_to_ptr.hbm [resolvable:$true] %s672_s20 }
  0x3c   : > { %s674_s6 = scalar_lea.hbm %s673_s20, 8  ;;  %s679_s8 = scalar_lea.hbm %s1183_s0, 32 }
  0x3d   : > { %p675_p10 = scmp.ne.s32.totalorder %s673_s20, %s674_s6  ;;  %p676_p11 = pneg %p1042_p6 }
  0x3e   : > { %p680_p5 = scmp.lt.s32.totalorder %s673_s20, %s1183_s0  ;;  %p681_p8 = scmp.lt.s32.totalorder %s679_s8, %s674_s6 }
  0x3f   : > { %p677_p4 = pnand %p676_p11, %p675_p10 }
  0x40   : > { %p682_p1 = por %p681_p8, %p680_p5 }
  0x41   : > { %p678_p13 = pneg %p677_p4 }
  0x43   : > { %p683_p0 = pnand %p682_p1, %p678_p13 }
  0x45   : > { %686 = shalt.err (!%p683_p0)
}
  0x46   : > { %544 = dma.hbm_to_vmem [thread:$0]  (!%p1042_p6), %s167_s27, 128, %s169_s26, %s157_s17  }
  0x47   : > { %p85_p10 = scmp.lt.s32.totalorder %s933_s23, 1  ;;  %s87_s20 = sadd.s32 1, %s933_s23 }
  0x48   : > { %p88_p11 = scmp.lt.s32.totalorder %s87_s20, 1  ;;  %s93_s6 = sadd.s32 1, %s826_s14 }
  0x49   : > { %s86_s28 = scalar_select %p85_p10, %s933_s23, 1 }
  0x4a   : > { %s1236_s20 = smov (!%p88_p11, %s87_s20), 1  ;;  %p100_p0 = scmp.ne.s32.totalorder %s826_s14, %s822_s13 }
  0x4b   : > { %p106_p1 = scmp.ne.s32.totalorder %s822_s13, %s818_s12  ;;  %s90_s30 = ssub.s32 %s86_s28, %s1236_s20 }
  0x4c   : > { %s199_s10 = sand.u32 1, %s826_s14   ;;  %p91_p4 = scmp.eq.s32.totalorder %s90_s30, 0 }
  0x4d   : > { %p1212_p13 = scmp.eq.s32.totalorder %s854_s21, 0  ;;  %p1213_p8 = scmp.eq.s32.totalorder %s930_s22, 0 }
  0x4e   : > { %s517_s17 = sshll.u32 %s199_s10, 3  ;;  %s518_s27 = sshll.u32 %s86_s28, 3 }
  0x4f   : > { %p102_p5 = por %p100_p0, %p1212_p13  ;;  %p1069_p7 = por %p106_p1, %p1213_p8 }
  0x50   : > { %s1074_s26 = scalar_select %p91_p4, %s826_s14, %s93_s6  }
  0x51   : > { %s208_s8 = scalar_lea.hbm %s1185_s2, %s518_s27  ;;  %s201_s5 = scalar_lea.vmem [#allocation7], %s517_s17 }
  0x52   : > { %s212_s12 = sshll.u32 %s201_s5, 4  ;;  %s210_s9 = sshll.u32 %s208_s8, 4  ;;  %s213_s12 = int_to_ptr.vmem [resolvable:$true] %s212_s12  ;;  %s211_s9 = int_to_ptr.hbm [resolvable:$true] %s210_s9 }
  0x53   : > { %p1215_p6 = scmp.lt.s32.totalorder %s854_s21, 2  ;;  %s702_s30 = sshra.s32 %s211_s9, 4  ;;  %s703_s30 = int_to_ptr.hbm [resolvable:$true] %s702_s30 }
  0x54   : > { %s704_s6 = scalar_lea.hbm %s703_s30, 8  ;;  %s709_s17 = scalar_lea.hbm %s1185_s2, 32 }
  0x55   : > { %p1081_p10 = pnand %p1215_p6, %p102_p5  ;;  %p705_p11 = scmp.ne.s32.totalorder %s703_s30, %s704_s6 }
  0x56   : > { %p710_p13 = scmp.lt.s32.totalorder %s703_s30, %s1185_s2  ;;  %p711_p5 = scmp.lt.s32.totalorder %s709_s17, %s704_s6 }
  0x57   : > { %p706_p0 = pneg %p1081_p10 }
  0x58   : > { %p712_p8 = por %p711_p5, %p710_p13 }
  0x59   : > { %p707_p1 = pnand %p706_p0, %p705_p11 }
  0x5b   : > { %p708_p4 = pneg %p707_p1 }
  0x5d   : > { %p713_p6 = pnand %p712_p8, %p708_p4 }
  0x5f   : > { %716 = shalt.err (!%p713_p6)
}
  0x60   : > { %550 = dma.hbm_to_vmem [thread:$0]  (!%p1081_p10), %s211_s9, 128, %s213_s12, %s979_s25  }
  0x61   : > { %221 = sbr.rel (%p996_p2) target bundleno = 260 (0x104), region = 32  ;;  %s1099_s1 = sand.u32 (!%p996_p2), 1, %s846_s19  }
  0x62   : > { %s520_s8 = sshll.u32 (!%p996_p2), %s1099_s1, 3  ;;  %s224_s5 = scalar_lea.sflag (!%p996_p2), [#allocation3], %s1099_s1 }
  0x63   : > { %s227_s30 = scalar_lea.vmem (!%p996_p2), [#allocation2], %s520_s8 }
  0x66   : > { %801 = dma.done.wait (%p1019_p12), %s224_s5, 128  }
  0x67   : > { %803 = vsyncadd (%p1019_p12), %s224_s5, 4294967168  ;;  %s233_s25 = sand.u32 1, %s930_s22   ;;  %s235_s4 = sand.u32 1, %s834_s16  }
  0x68   : > { %s521_s12 = sshll.u32 %s235_s4, 3  ;;  %s234_s9 = scalar_lea.sflag [#allocation6], %s233_s25 }
  0x69   : > { %s237_s20 = scalar_lea.vmem [#allocation5], %s521_s12 }
  0x6a   : > { %805 = dma.done.wait (%p955_p9), %s234_s9, 128  }
  0x6b   : > { %807 = vsyncadd (%p955_p9), %s234_s9, 4294967168  ;;  %s245_s6 = sand.u32 1, %s822_s13  }
  0x6c   : > { %s522_s28 = sshll.u32 %s245_s6, 3 }
  0x6d   : > { %s247_s10 = scalar_lea.vmem [#allocation7], %s522_s28 }
  0x6e   : > { %809 = dma.done.wait (%p1069_p7), %s234_s9, 128  }
  0x6f   : > { %811 = vsyncadd (%p1069_p7), %s234_s9, 4294967168  ;;  %p1217_p2 = scmp.gt.s32.totalorder %s930_s22, 0  ;;  %s531_s17 = sshll.u32 %s930_s22, 3  ;;  %v288_v1 = vld [vmem:[%s237_s20] sm:$0xff]  ;;  %v287_v2 = vld [vmem:[%s227_s30] sm:$0xff]  ;;  %vm312_vm0 = vcmask 7168  }
  0x70   : > { %s532_s27 = sadd.s32 8, %s531_s17  ;;  %s856_s7 = smov 127   ;;  %v293_v4 = vld [vmem:[%s247_s10] sm:$0xff]  ;;  %vm325_vm1 = vcmask 121856   ;;  %vm349_vm2 = vcmask 1045504   ;;  %vm364_vm3 = vcmask 1041408  }
  0x71   : > { %s290_s11 = scalar_select %p1217_p2, 1.0, 0.0  ;;  %318 = vrot.lane.b32.xlu1 %v287_v2, %s856_s7  ;;  %vm358_vm4 = vcmask 130055   ;;  %vm360_vm5 = vcmask 129024   ;;  %vm372_vm6 = vcmask 130049   ;;  %vm374_vm7 = vcmask 122880  }
  0x72   : > { %p296_p12 = scmp.lt.s32.totalorder %s532_s27, 16  ;;  %s857_s15 = smov 1  }
  0x73   : > { %v291_v0 = vstv %s290_s11  ;;  %s523_s8 = sshll.u32 %s1099_s1, 4  ;;  %s387_s25 = scalar_lea.hbm %s1186_s3, %s531_s17 }
  0x74   : > { %s297_s29 = scalar_select %p296_p12, 1.0, 0.0  ;;  %v292_v3 = vmul.f32 %v291_v0, %v288_v1 }
  0x75   : > { %s390_s4 = sshll.u32 %s387_s25, 4  ;;  %s280_s12 = scalar_lea.vmem [#allocation8], %s523_s8  ;;  %s1132_s4 = int_to_ptr.hbm [resolvable:$true] %s390_s4 }
  0x76   : > { %v298_v5 = vstv %s297_s29  ;;  %303 = vrot.lane.b32.xlu0 %v292_v3, %s857_s15  ;;  %316 = vrot.lane.b32.xlu2 %v292_v3, %s856_s7  ;;  %s388_s9 = sshll.u32 %s280_s12, 4  ;;  %s377_s22 = scalar_lea.sflag [#allocation4], %s1099_s1  ;;  %s389_s9 = int_to_ptr.vmem [resolvable:$true] %s388_s9 }
  0x77   : > { %v299_v6 = vmul.f32 %v298_v5, %v293_v4  ;;  %s746_s20 = sshra.s32 %s1132_s4, 4  ;;  %s752_s11 = scalar_lea.hbm %s1186_s3, 32  ;;  %s747_s20 = int_to_ptr.hbm [resolvable:$true] %s746_s20 }
  0x78   : > { %s748_s6 = scalar_lea.hbm %s747_s20, 16  ;;  %p753_p11 = scmp.lt.s32.totalorder %s747_s20, %s1186_s3 }
  0x79   : > { %307 = vrot.lane.b32.xlu1 %v299_v6, %s857_s15  ;;  %p749_p9 = scmp.ne.s32.totalorder %s747_s20, %s748_s6  ;;  %p754_p0 = scmp.lt.s32.totalorder %s752_s11, %s748_s6 }
  0x7b   : > { %p750_p7 = pnand %p749_p9, %p1025_p3  ;;  %p755_p1 = por %p754_p0, %p753_p11 }
  0x7d   : > { %p751_p10 = pneg %p750_p7 }
  0x7e   : > { %305 = vrot.lane.b32.xlu0 %v287_v2, %s857_s15  ;;  %320 = vrot.lane.b32.xlu2 %v299_v6, %s856_s7 }
  0x7f   : > { %p756_p4 = pnand %p755_p1, %p751_p10 }
  0xd0   : > { %v317_v7 = vpop.permute.xlu2 %316 }
  0xd1   : > { %v326_v16 = vsel %vm325_vm1, %v317_v7, 0.0 }
  0xd8   : > { %v321_v11 = vpop.permute.xlu2 %320 }
  0xd9   : > { %v328_v13 = vsel %vm325_vm1, %v321_v11, 0.0 }
  0xe3   : > { %v319_v8 = vpop.permute.xlu1 %318 }
  0xe4   : > { %v327_v19 = vsel %vm325_vm1, %v319_v8, 0.0 }
  0xe8   : > { %v304_v9 = vpop.permute.xlu0 %303 }
  0xe9   : > { %v313_v10 = vsel %vm312_vm0, 0.0, %v304_v9 }
  0xea   : > { %v332_v12 = vadd.f32 %v313_v10, %v292_v3  ;;  %v329_v25 = vsub.f32 %v313_v10, %v326_v16 }
  0xeb   : > { %v308_v14 = vpop.permute.xlu1 %307 }
  0xec   : > { %v315_v15 = vsel %vm312_vm0, 0.0, %v308_v14  ;;  %v335_v17 = vadd.f32 %v332_v12, %v292_v3 }
  0xed   : > { %v331_v20 = vsub.f32 %v315_v15, %v328_v13  ;;  %v334_v21 = vadd.f32 %v315_v15, %v299_v6 }
  0xee   : > { %v338_v26 = vadd.f32 %v335_v17, %v326_v16 }
  0xef   : > { %v337_v29 = vadd.f32 %v334_v21, %v299_v6  ;;  %v351_v30 = vrot.slane %v331_v20, 2 }
  0xf0   : > { %v306_v18 = vpop.permute.xlu0 %305  ;;  %v365_v35 = vrot.slane %v338_v26, 6 }
  0xf1   : > { %v314_v22 = vsel %vm312_vm0, 0.0, %v306_v18  ;;  %v340_v39 = vadd.f32 %v337_v29, %v328_v13 }
  0xf2   : > { %v330_v23 = vsub.f32 %v314_v22, %v327_v19  ;;  %v333_v24 = vadd.f32 %v314_v22, %v287_v2 }
  0xf4   : > { %v336_v27 = vadd.f32 %v333_v24, %v287_v2  ;;  %v342_v28 = vrot.slane %v330_v23, 1  ;;  %v350_v31 = vrot.slane %v330_v23, 2 }
  0xf6   : > { %v339_v32 = vadd.f32 %v336_v27, %v327_v19  ;;  %v344_v33 = vadd.f32 %v342_v28, %v329_v25  ;;  %v345_v34 = vadd.f32 %v342_v28, %v330_v23  ;;  %v352_v40 = vsel %vm349_vm2, %v350_v31, %v351_v30 }
  0xf8   : > { %v346_v36 = vadd.f32 %v344_v33, %v342_v28  ;;  %v347_v37 = vadd.f32 %v345_v34, %v342_v28  ;;  %v366_v38 = vrot.slane %v339_v32, 6 }
  0xfa   : > { %v355_v41 = vadd.f32 %v350_v31, %v346_v36  ;;  %v356_v42 = vadd.f32 %v352_v40, %v347_v37  ;;  %v367_v43 = vsel %vm364_vm3, %v365_v35, %v366_v38  ;;  %v371_v45 = vsub.f32 %v340_v39, %v366_v38 }
  0xfb   : > { %v370_v44 = vsub.f32 %v339_v32, %v367_v43 }
  0xfc   : > { %525 = vst.msk [vmem:[%s280_s12 + $0x1] sm:$0x80] %vm358_vm4, %v355_v41 }
  0xfd   : > { %526 = vst.msk [vmem:[%s280_s12 + $0x9] sm:$0x7f] %vm360_vm5, %v356_v42 }
  0xfe   : > { %373 = vst.msk [vmem:[%s280_s12 - $0x1] sm:$0xfe] %vm372_vm6, %v370_v44 }
  0xff   : > { %375 = vst.msk [vmem:[%s280_s12 + $0x7] sm:$0x1] %vm374_vm7, %v371_v45 }
 0x100   : > { %759 = shalt.err (!%p756_p4)
}
 0x101   : > { %s858_s1 = smov 128   ;;  %s859_s29 = smov 256  }
 0x102   : > { %s860_s7 = smov 8  }
 0x103   : > { %539 = dma.vmem_to_hbm [thread:$0]  (%p1025_p3), %s389_s9, 256, %s1132_s4, %s377_s22, %s858_s1, %s859_s29, %s860_s7  }
 0x104 PF: > { %s1218_s15 = sld [smem:[#allocation17_spill]]  ;;  %s405_s8 = sand.u32 1, %s842_s18  }
 0x105   : > { %p1220_p5 = scmp.ge.s32.totalorder %s854_s21, 2  ;;  %s406_s5 = scalar_lea.sflag [#allocation4], %s405_s8 }
 0x10a   : > { %p1219_p13 = scmp.ne.s32.totalorder %s1218_s15, 0 }
 0x10c   : > { %p552_p8 = pnand %p1220_p5, %p1219_p13 }
 0x10e   : > { %p553_p6 = pneg %p552_p8 }
 0x110   : > { %813 = dma.done.wait (%p553_p6), %s406_s5, 256  }
 0x111   : > { %815 = vsyncadd (%p553_p6), %s406_s5, 4294967040  ;;  %s1221_s30 = sld [smem:[#allocation13_spill]]  ;;  %p19_p3 = scmp.ge.s32.totalorder %s933_s23, 4  }
 0x112   : > { %s1222_s17 = sld [smem:[#allocation15_spill]]  ;;  %s1225_s12 = smov %s822_s13 }
 0x113   : > { %s1223_s24 = sld [smem:[#allocation14_spill]]  ;;  %s1226_s13 = smov %s826_s14 }
 0x114   : > { %s1224_s20 = sld [smem:[#allocation16_spill]]  ;;  %s1227_s14 = smov %s1074_s26 }
 0x115   : > { %s1228_s15 = smov %s834_s16  ;;  %s1230_s18 = smov %s846_s19 }
 0x116   : > { %s1232_s21 = smov %s933_s23  ;;  %21 = sbr.rel (!%p19_p3) target bundleno = 12 (0xc), region = 102 }
 0x117   : > { %s1229_s16 = smov %s1221_s30 }
 0x119   : > { %s1231_s19 = smov %s1223_s24 }
 0x11b   :  { %412 = vsyncpa [#allocation3], 1 }
 0x11c   :  { %414 = vsyncpa [#allocation3 + $0x1], 1 }
 0x11d   :  { %415 = vsyncpa [#allocation6], 1 }
 0x11e   :  { %417 = vsyncpa [#allocation6 + $0x1], 1 }
 0x11f   :  { %418 = vsyncpa [#allocation4], 1 }
 0x120   :  { %420 = vsyncpa [#allocation4 + $0x1], 1 }

</bundles_post_ra>
